<compile_context>
chip_gen: v7x
topology: tpu7x:2x2x1
jax: 0.10.0
libtpu: 0.0.40
codegen_flags: <defaults>
</compile_context>

<pallas_src>
import math

import jax
import jax.numpy as jnp
from jax import lax
from jax.experimental import pallas as pl
from jax.experimental.pallas import tpu as pltpu

_LANES = 128
_SUBLANES = 8


def _round_up(x, m):
    return (x + m - 1) // m * m


def critic_kernel(x_ref, w1t_ref, b1_ref, w2t_ref, b2_ref, w3_ref, b3_ref, o_ref):
    """One batch tile of the MLP, computed batch-on-lanes (activations transposed).

    x_ref:   (tb, state_dim) f32 (or bf16)
    w1t_ref: (h1, state_dim) bf16/f32     b1_ref: (h1, 1) f32
    w2t_ref: (h2, h1)        bf16/f32     b2_ref: (h2, 1) f32
    w3_ref:  (h2, 1) f32 (last-layer weight as a column)
    b3_ref:  (1, 1)  f32
    o_ref:   (1, tb) f32  (lane-dense row of per-example values)
    """
    x = x_ref[...]
    w1t = w1t_ref[...]
    w2t = w2t_ref[...]

    # Layer 1: NT matmul contracting state_dim (last dim of both operands) so the
    # batch lands on the lane axis: (h1, tb). MXU with f32 accumulation.
    h1 = jnp.tanh(
        lax.dot_general(
            w1t, x.astype(w1t.dtype),
            (((1,), (1,)), ((), ())),
            preferred_element_type=jnp.float32,
        )
        + b1_ref[...]
    )

    # Layer 2: standard NN matmul, (h2, h1) @ (h1, tb) -> (h2, tb).
    h2 = jnp.tanh(
        jnp.dot(w2t, h1.astype(w2t.dtype), preferred_element_type=jnp.float32)
        + b2_ref[...]
    )

    # out_dim == 1: VPU multiply + sublane reduce -> already lane-dense (1, tb);
    # no MXU drain for a 1-row result.
    v = jnp.sum(h2 * w3_ref[...], axis=0, keepdims=True) + b3_ref[...]
    o_ref[...] = v.astype(o_ref.dtype)


def critic_forward(state, packed_params, *, batch_tile=4096):
    """state: (B, state_dim); packed_params from pack_critic_params. Returns (B, 1) f32."""
    w1t, b1, w2t, b2, w3, b3 = packed_params
    B, state_dim = state.shape
    h1 = w1t.shape[0]
    h2 = w2t.shape[0]

    # Batch tile: multiple of 128 so the batch axis fills the lanes of the transposed
    # activations and the (1, tb) output row is lane-dense; large to amortize the
    # ~0.35us per-grid-step overhead.
    bp_min = _round_up(B, _LANES)
    tb = min(_round_up(batch_tile, _LANES), bp_min)
    # v7x megacore: ensure >=2 "parallel" grid steps whenever the batch can be split,
    # so both TensorCores get work (harmless on v5e/v6e).
    if bp_min >= 2 * _LANES:
        tb = min(tb, _round_up((bp_min + 1) // 2, _LANES))
    Bp = _round_up(B, tb)
    grid = Bp // tb
    if Bp != B:
        state = jnp.pad(state, ((0, Bp - B), (0, 0)))

    full = lambda shape: pl.BlockSpec(shape, lambda i: (0,) * len(shape))

    weight_bytes = sum(int(a.size) * a.dtype.itemsize for a in packed_params)
    cost = pl.CostEstimate(
        flops=int(2 * Bp * (state_dim * h1 + h1 * h2 + h2)),
        transcendentals=int(Bp * (h1 + h2)),
        bytes_accessed=int(
            Bp * state_dim * state.dtype.itemsize + Bp * 4 + weight_bytes
        ),
    )

    out = pl.pallas_call(
        critic_kernel,
        out_shape=jax.ShapeDtypeStruct((1, Bp), jnp.float32),
        grid_spec=pltpu.PrefetchScalarGridSpec(
            num_scalar_prefetch=0,
            grid=(grid,),
            in_specs=[
                pl.BlockSpec((tb, state_dim), lambda i: (i, 0)),  # state tile
                full((h1, state_dim)),  # W1^T
                full((h1, 1)),          # b1 column
                full((h2, h1)),         # W2^T
                full((h2, 1)),          # b2 column
                full((h2, 1)),          # W3 column
                full((1, 1)),           # b3
            ],
            out_specs=pl.BlockSpec((1, tb), lambda i: (0, i)),
        ),
        compiler_params=pltpu.CompilerParams(
            dimension_semantics=("parallel",),
            vmem_limit_bytes=32 * 1024 * 1024,
        ),
        cost_estimate=cost,
    )(state, w1t, b1, w2t, b2, w3, b3)

    out = out.reshape(-1, 1)  # (1, Bp) -> (Bp, 1): contiguous row-major, free.
    return out[:B] if Bp != B else out


def init_critic_params(key, state_dim, layers=(64, 64)):
    """torch.nn.Linear default init (U[-1/sqrt(fan_in), +1/sqrt(fan_in)]).
    Weights stored as (in_dim, out_dim); biases as (1, out_dim)."""
    sizes = (state_dim,) + tuple(layers) + (1,)
    params = []
    for i in range(len(sizes) - 1):
        fan_in, fan_out = sizes[i], sizes[i + 1]
        key, kw, kb = jax.random.split(key, 3)
        bound = 1.0 / math.sqrt(fan_in)
        w = jax.random.uniform(kw, (fan_in, fan_out), jnp.float32,
                               minval=-bound, maxval=bound)
        b = jax.random.uniform(kb, (1, fan_out), jnp.float32,
                               minval=-bound, maxval=bound)
        params += [w, b]
    return tuple(params)


def pack_critic_params(params, *, matmul_dtype=jnp.bfloat16):
    """Repack for the batch-on-lanes kernel: weights transposed to (out, in), biases as
    (out, 1) columns, hidden dims zero-padded only to a multiple of 8 (sublanes) — no
    128-lane padding needed. Exact: padded rows give tanh(0)=0 and meet zero weights.
    The two MXU weight matrices are cast to `matmul_dtype`."""
    w1, b1, w2, b2, w3, b3 = params
    h1, h2 = w1.shape[1], w2.shape[1]
    hp1, hp2 = _round_up(h1, _SUBLANES), _round_up(h2, _SUBLANES)
    w1t = jnp.pad(w1.T, ((0, hp1 - h1), (0, 0))).astype(matmul_dtype)        # (hp1, sd)
    b1c = jnp.pad(b1.T, ((0, hp1 - h1), (0, 0)))                             # (hp1, 1)
    w2t = jnp.pad(w2.T, ((0, hp2 - h2), (0, hp1 - h1))).astype(matmul_dtype)  # (hp2, hp1)
    b2c = jnp.pad(b2.T, ((0, hp2 - h2), (0, 0)))                             # (hp2, 1)
    w3c = jnp.pad(w3, ((0, hp2 - h2), (0, 0)))                               # (hp2, 1) f32
    return (w1t, b1c, w2t, b2c, w3c, b3)


def critic_reference(state, params):
    w1, b1, w2, b2, w3, b3 = params
    h = jnp.tanh(state @ w1 + b1)
    h = jnp.tanh(h @ w2 + b2)
    return h @ w3 + b3


if __name__ == "__main__":
    key = jax.random.PRNGKey(0)
    k_param, k_state, k_state2, k_state3 = jax.random.split(key, 4)

    state_dim = 32
    layers = (64, 64)
    params = init_critic_params(k_param, state_dim, layers)

    # Small batch (single grid step).
    batch = 8
    state = jax.random.normal(k_state, (batch, state_dim), jnp.float32)
    ref = critic_reference(state, params)

    # Exact path: f32 matmul operands -> matches reference to float tolerance.
    packed_f32 = pack_critic_params(params, matmul_dtype=jnp.float32)
    out_f32 = jax.block_until_ready(critic_forward(state, packed_f32))
    assert out_f32.shape == (batch, 1), out_f32.shape
    assert jnp.allclose(out_f32, ref, atol=1e-5, rtol=1e-5), (out_f32, ref)

    # Fast path: bf16 matmul operands (MXU-native), f32 accumulation/bias/tanh.
    packed_bf16 = pack_critic_params(params, matmul_dtype=jnp.bfloat16)
    out_bf16 = jax.block_until_ready(critic_forward(state, packed_bf16))
    assert out_bf16.shape == (batch, 1), out_bf16.shape
    assert jnp.allclose(out_bf16, ref, atol=3e-2, rtol=0.0), (out_bf16, ref)

    # Ragged batch + explicit small tile (multi-step "parallel" grid + padding).
    batch2 = 300
    state2 = jax.random.normal(k_state2, (batch2, state_dim), jnp.float32)
    ref2 = critic_reference(state2, params)
    out2 = jax.block_until_ready(
        critic_forward(state2, packed_f32, batch_tile=128)
    )
    assert out2.shape == (batch2, 1), out2.shape
    assert jnp.allclose(out2, ref2, atol=1e-5, rtol=1e-5), (out2, ref2)

    # Default tile, medium batch: exercises the ">=2 grid steps" megacore split.
    batch3 = 1000
    state3 = jax.random.normal(k_state3, (batch3, state_dim), jnp.float32)
    ref3 = critic_reference(state3, params)
    out3 = jax.block_until_ready(critic_forward(state3, packed_f32))
    assert out3.shape == (batch3, 1), out3.shape
    assert jnp.allclose(out3, ref3, atol=1e-5, rtol=1e-5), (out3, ref3)

    print("KERNEL_OK")
</pallas_src>

<mosaic_0001>
module attributes {stable_mosaic.version = 11 : i64} {
  func.func @critic_kernel(%arg0: i32, %arg1: memref<128x32xf32, #tpu.memory_space<vmem>>, %arg2: memref<64x32xf32, #tpu.memory_space<vmem>>, %arg3: memref<64x1xf32, #tpu.memory_space<vmem>>, %arg4: memref<64x64xf32, #tpu.memory_space<vmem>>, %arg5: memref<64x1xf32, #tpu.memory_space<vmem>>, %arg6: memref<64x1xf32, #tpu.memory_space<vmem>>, %arg7: memref<1x1xf32, #tpu.memory_space<vmem>>, %arg8: memref<1x128xf32, #tpu.memory_space<vmem>>) attributes {dimension_semantics = [#tpu.dimension_semantics<parallel>], iteration_bounds = array<i64: 1>, scalar_prefetch = 0 : i64, scratch_operands = 0 : i64, tpu.core_type = #tpu.core_type<tc>, window_params = [{transform_indices = @transform_0, window_bounds = array<i64: 128, 32>}, {pipeline_mode = #tpu.pipeline_mode<synchronous>, transform_indices = @transform_1, window_bounds = array<i64: 64, 32>}, {pipeline_mode = #tpu.pipeline_mode<synchronous>, transform_indices = @transform_2, window_bounds = array<i64: 64, 1>}, {pipeline_mode = #tpu.pipeline_mode<synchronous>, transform_indices = @transform_3, window_bounds = array<i64: 64, 64>}, {pipeline_mode = #tpu.pipeline_mode<synchronous>, transform_indices = @transform_4, window_bounds = array<i64: 64, 1>}, {pipeline_mode = #tpu.pipeline_mode<synchronous>, transform_indices = @transform_5, window_bounds = array<i64: 64, 1>}, {pipeline_mode = #tpu.pipeline_mode<synchronous>, transform_indices = @transform_6, window_bounds = array<i64: 1, 1>}, {transform_indices = @transform_7, window_bounds = array<i64: 1, 128>}]} {
    %c0 = arith.constant 0 : index
    %c0_0 = arith.constant 0 : index
    %0 = vector.load %arg1[%c0, %c0_0] : memref<128x32xf32, #tpu.memory_space<vmem>>, vector<128x32xf32>
    %c0_1 = arith.constant 0 : index
    %c0_2 = arith.constant 0 : index
    %1 = vector.load %arg2[%c0_1, %c0_2] : memref<64x32xf32, #tpu.memory_space<vmem>>, vector<64x32xf32>
    %c0_3 = arith.constant 0 : index
    %c0_4 = arith.constant 0 : index
    %2 = vector.load %arg4[%c0_3, %c0_4] : memref<64x64xf32, #tpu.memory_space<vmem>>, vector<64x64xf32>
    %cst = arith.constant dense<0.000000e+00> : vector<64x128xf32>
    %3 = tpu.matmul %1, %0, %cst {dimension_numbers = #tpu.dot_dimension_numbers<[1], [1], [0], [0], [0, 0, 1, 0], [], []>} : vector<64x32xf32>, vector<128x32xf32>, vector<64x128xf32> -> vector<64x128xf32>
    %c0_5 = arith.constant 0 : index
    %c0_6 = arith.constant 0 : index
    %4 = vector.load %arg3[%c0_5, %c0_6] : memref<64x1xf32, #tpu.memory_space<vmem>>, vector<64x1xf32>
    %5 = vector.broadcast %4 : vector<64x1xf32> to vector<64x128xf32>
    %6 = arith.addf %3, %5 : vector<64x128xf32>
    %7 = math.tanh %6 : vector<64x128xf32>
    %cst_7 = arith.constant dense<0.000000e+00> : vector<64x128xf32>
    %8 = tpu.matmul %2, %7, %cst_7 {dimension_numbers = #tpu.dot_dimension_numbers<[1], [0], [0], [1], [0, 0, 1, 1], [], []>} : vector<64x64xf32>, vector<64x128xf32>, vector<64x128xf32> -> vector<64x128xf32>
    %c0_8 = arith.constant 0 : index
    %c0_9 = arith.constant 0 : index
    %9 = vector.load %arg5[%c0_8, %c0_9] : memref<64x1xf32, #tpu.memory_space<vmem>>, vector<64x1xf32>
    %10 = vector.broadcast %9 : vector<64x1xf32> to vector<64x128xf32>
    %11 = arith.addf %8, %10 : vector<64x128xf32>
    %12 = math.tanh %11 : vector<64x128xf32>
    %c0_10 = arith.constant 0 : index
    %c0_11 = arith.constant 0 : index
    %13 = vector.load %arg6[%c0_10, %c0_11] : memref<64x1xf32, #tpu.memory_space<vmem>>, vector<64x1xf32>
    %14 = vector.broadcast %13 : vector<64x1xf32> to vector<64x128xf32>
    %15 = arith.mulf %12, %14 : vector<64x128xf32>
    %cst_12 = arith.constant dense<0.000000e+00> : vector<128xf32>
    %16 = vector.multi_reduction <add>, %15, %cst_12 [0] : vector<64x128xf32> to vector<128xf32>
    %17 = vector.shape_cast %16 : vector<128xf32> to vector<1x128xf32>
    %c0_13 = arith.constant 0 : index
    %c0_14 = arith.constant 0 : index
    %18 = vector.load %arg7[%c0_13, %c0_14] : memref<1x1xf32, #tpu.memory_space<vmem>>, vector<1x1xf32>
    %19 = vector.broadcast %18 : vector<1x1xf32> to vector<1x128xf32>
    %20 = arith.addf %17, %19 : vector<1x128xf32>
    %c0_15 = arith.constant 0 : index
    %c0_16 = arith.constant 0 : index
    %21 = vector.load %arg8[%c0_15, %c0_16] : memref<1x128xf32, #tpu.memory_space<vmem>>, vector<1x128xf32>
    tpu.vector_store %arg8[%c0_15, %c0_16], %20 {strides = array<i32>} : memref<1x128xf32, #tpu.memory_space<vmem>>, vector<1x128xf32>,
    return
  }
  func.func @transform_0(%arg0: i32) -> (i32, i32) {
    %c0_i32 = arith.constant 0 : i32
    %c0_i32_0 = arith.constant 0 : i32
    return %arg0, %c0_i32 : i32, i32
  }
  func.func @transform_1(%arg0: i32) -> (i32, i32) {
    %c0_i32 = arith.constant 0 : i32
    %c0_i32_0 = arith.constant 0 : i32
    %c0_i32_1 = arith.constant 0 : i32
    return %c0_i32, %c0_i32_0 : i32, i32
  }
  func.func @transform_2(%arg0: i32) -> (i32, i32) {
    %c0_i32 = arith.constant 0 : i32
    %c0_i32_0 = arith.constant 0 : i32
    %c0_i32_1 = arith.constant 0 : i32
    return %c0_i32, %c0_i32_0 : i32, i32
  }
  func.func @transform_3(%arg0: i32) -> (i32, i32) {
    %c0_i32 = arith.constant 0 : i32
    %c0_i32_0 = arith.constant 0 : i32
    %c0_i32_1 = arith.constant 0 : i32
    return %c0_i32, %c0_i32_0 : i32, i32
  }
  func.func @transform_4(%arg0: i32) -> (i32, i32) {
    %c0_i32 = arith.constant 0 : i32
    %c0_i32_0 = arith.constant 0 : i32
    %c0_i32_1 = arith.constant 0 : i32
    return %c0_i32, %c0_i32_0 : i32, i32
  }
  func.func @transform_5(%arg0: i32) -> (i32, i32) {
    %c0_i32 = arith.constant 0 : i32
    %c0_i32_0 = arith.constant 0 : i32
    %c0_i32_1 = arith.constant 0 : i32
    return %c0_i32, %c0_i32_0 : i32, i32
  }
  func.func @transform_6(%arg0: i32) -> (i32, i32) {
    %c0_i32 = arith.constant 0 : i32
    %c0_i32_0 = arith.constant 0 : i32
    %c0_i32_1 = arith.constant 0 : i32
    return %c0_i32, %c0_i32_0 : i32, i32
  }
  func.func @transform_7(%arg0: i32) -> (i32, i32) {
    %c0_i32 = arith.constant 0 : i32
    %c0_i32_0 = arith.constant 0 : i32
    return %c0_i32, %arg0 : i32, i32
  }
}

</mosaic_0001>

<bundles_post_ra>
// kernel: tpu_custom_call.1
= control target key start
LH: loop header
LB: loop body
LE: loop exit
PB: predicated region body
PF: predicated region fallthrough
CT: control target
= control target key end

     0   :  { %s1123_s0 = inlined_call_operand.vmem [shape: f32[128,32], index: 0, kind: input, shape index: {}]   ;;  %s1124_s1 = inlined_call_operand.vmem [shape: f32[64,32], index: 1, kind: input, shape index: {}]   ;;  %s1125_s2 = inlined_call_operand.vmem [shape: f32[64,1], index: 2, kind: input, shape index: {}]   ;;  %s1126_s3 = inlined_call_operand.vmem [shape: f32[64,64], index: 3, kind: input, shape index: {}]   ;;  %s1127_s4 = inlined_call_operand.vmem [shape: f32[64,1], index: 4, kind: input, shape index: {}]   ;;  %s1128_s5 = inlined_call_operand.vmem [shape: f32[64,1], index: 5, kind: input, shape index: {}]   ;;  %s1129_s6 = inlined_call_operand.<no memory space> [shape: f32[1,1], index: 6, kind: input, shape index: {}]   ;;  %s1130_s7 = inlined_call_operand.hbm [shape: f32[1,128], index: 7, kind: output, shape index: {}]  }
   0x1   :  { %v12_v0 = vstv %s1129_s6 }
   0x2   :  { %13 = vst [vmem:[#allocation2] sm:$0x1] %v12_v0 }
   0x3   :  { %v29_v1 = vld [vmem:[%s1123_s0] sm:$0xff]  ;;  %v30_v2 = vld [vmem:[%s1123_s0 + $0x8] sm:$0xff]  ;;  %vm109_vm0 = vcmask 261120   ;;  %v31_v3 = vld [vmem:[%s1123_s0 + $0x10] sm:$0xff]  ;;  %v844_v7 = vmov 0  }
   0x4   :  { %v720_v4 = vpack.c.bf16 %v30_v2, %v29_v1  ;;  %vm900_vm1 = vmpackc.low %vm109_vm0, %vm109_vm0  ;;  %v32_v6 = vld [vmem:[%s1123_s0 + $0x18] sm:$0xff]  ;;  %786 = vset.pattern.permute.xlu0 %v844_v7  ;;  %787 = vset.pattern.permute.xlu1 %v844_v7  ;;  %v45_v9 = vld [vmem:[%s1124_s1] sm:$0xff] }
   0x5   :  { %v726_v8 = vpack.c.bf16 %v32_v6, %v31_v3  ;;  %v33_v10 = vld [vmem:[%s1123_s0 + $0x20] sm:$0xff]  ;;  %v34_v11 = vld [vmem:[%s1123_s0 + $0x28] sm:$0xff]  ;;  %680 = vmatprep.mubr.msk.f32.mxu0 %vm109_vm0, %v45_v9  ;;  %v63_v14 = vld [vmem:[%s1125_s2 + $0x10] sm:$0xff] }
   0x6   :  { %722 = vmatprep.subr.msk.bf16.mxu0 %vm900_vm1, %v720_v4  ;;  %v61_v12 = vld [vmem:[%s1125_s2] sm:$0xff]  ;;  %v732_v13 = vpack.c.bf16 %v34_v11, %v33_v10  ;;  %v62_v15 = vld [vmem:[%s1125_s2 + $0x8] sm:$0xff]  ;;  %81 = vperm.xlu1 %787, %v63_v14   ;;  %v64_v16 = vld [vmem:[%s1125_s2 + $0x18] sm:$0xff] }
   0x7   :  { %725 = vmatpush3.bf16.xpose.msk.msra.mxu0 %vm900_vm1, %v720_v4  ;;  %71 = vperm.xlu0 %786, %v61_v12   ;;  %v35_v17 = vld [vmem:[%s1123_s0 + $0x30] sm:$0xff]  ;;  %v36_v18 = vld [vmem:[%s1123_s0 + $0x38] sm:$0xff]  ;;  %v65_v19 = vld [vmem:[%s1125_s2 + $0x20] sm:$0xff] }
   0x8   :  { %728 = vmatprep.subr.msk.bf16.mxu0 %vm900_vm1, %v726_v8  ;;  %v66_v20 = vld [vmem:[%s1125_s2 + $0x28] sm:$0xff] }
   0xa   :  { %86 = vperm.xlu1 %787, %v64_v16  }
   0xb   :  { %76 = vperm.xlu0 %786, %v62_v15  }
   0xf   :  { %731 = vmatpush3.bf16.xpose.msk.msra.mxu0 %vm900_vm1, %v726_v8 }
  0x10   :  { %734 = vmatprep.subr.msk.bf16.mxu0 %vm900_vm1, %v732_v13 }
  0x11   :  { %14 = vsyncpa [#allocation4], 0  ;;  %v738_v21 = vpack.c.bf16 %v36_v18, %v35_v17  ;;  %91 = vperm.xlu0 %786, %v65_v19   ;;  %v67_v22 = vld [vmem:[%s1125_s2 + $0x30] sm:$0xff]  ;;  %96 = vperm.xlu1 %787, %v66_v20   ;;  %v68_v23 = vld [vmem:[%s1125_s2 + $0x38] sm:$0xff]  ;;  %vm343_vm2 = vcmask 523264  }
  0x12   :  { %v37_v24 = vld [vmem:[%s1123_s0 + $0x40] sm:$0xff]  ;;  %v38_v25 = vld [vmem:[%s1123_s0 + $0x48] sm:$0xff]  ;;  %v297_v29 = vld [vmem:[%s1127_s4 + $0x10] sm:$0xff] }
  0x13   :  { %v295_v26 = vld [vmem:[%s1127_s4] sm:$0xff]  ;;  %v296_v27 = vld [vmem:[%s1127_s4 + $0x8] sm:$0xff]  ;;  %v744_v28 = vpack.c.bf16 %v38_v25, %v37_v24  ;;  %v298_v30 = vld [vmem:[%s1127_s4 + $0x18] sm:$0xff] }
  0x14   :  { %v39_v31 = vld [vmem:[%s1123_s0 + $0x50] sm:$0xff]  ;;  %v40_v32 = vld [vmem:[%s1123_s0 + $0x58] sm:$0xff]  ;;  %v299_v33 = vld [vmem:[%s1127_s4 + $0x20] sm:$0xff] }
  0x15   :  { %101 = vperm.xlu0 %786, %v67_v22   ;;  %106 = vperm.xlu1 %787, %v68_v23   ;;  %v300_v34 = vld [vmem:[%s1127_s4 + $0x28] sm:$0xff]  ;;  %v750_v35 = vpack.c.bf16 %v40_v32, %v39_v31  ;;  %v301_v36 = vld [vmem:[%s1127_s4 + $0x30] sm:$0xff]  ;;  %v302_v37 = vld [vmem:[%s1127_s4 + $0x38] sm:$0xff] }
  0x16   :  { %v41_v38 = vld [vmem:[%s1123_s0 + $0x60] sm:$0xff]  ;;  %v42_v39 = vld [vmem:[%s1123_s0 + $0x68] sm:$0xff]  ;;  %v483_v43 = vld [vmem:[%s1128_s5 + $0x10] sm:$0xff] }
  0x17   :  { %737 = vmatpush3.bf16.xpose.msk.msra.mxu0 %vm900_vm1, %v732_v13  ;;  %v481_v40 = vld [vmem:[%s1128_s5] sm:$0xff]  ;;  %v482_v41 = vld [vmem:[%s1128_s5 + $0x8] sm:$0xff]  ;;  %v756_v42 = vpack.c.bf16 %v42_v39, %v41_v38  ;;  %v484_v44 = vld [vmem:[%s1128_s5 + $0x18] sm:$0xff] }
  0x18   :  { %740 = vmatprep.subr.msk.bf16.mxu0 %vm900_vm1, %v738_v21  ;;  %v43_v45 = vld [vmem:[%s1123_s0 + $0x70] sm:$0xff]  ;;  %v44_v46 = vld [vmem:[%s1123_s0 + $0x78] sm:$0xff]  ;;  %v485_v47 = vld [vmem:[%s1128_s5 + $0x20] sm:$0xff] }
  0x19   :  { %305 = vperm.xlu0 %786, %v295_v26   ;;  %310 = vperm.xlu1 %787, %v296_v27   ;;  %v486_v48 = vld [vmem:[%s1128_s5 + $0x28] sm:$0xff]  ;;  %v762_v49 = vpack.c.bf16 %v44_v46, %v43_v45  ;;  %v487_v50 = vld [vmem:[%s1128_s5 + $0x30] sm:$0xff]  ;;  %v488_v51 = vld [vmem:[%s1128_s5 + $0x38] sm:$0xff] }
  0x1a   :  { %v550_v52 = vld [vmem:[#allocation2] sm:$0x1]  ;;  %v46_v53 = vld [vmem:[%s1124_s1 + $0x8] sm:$0xff]  ;;  %v47_v54 = vld [vmem:[%s1124_s1 + $0x10] sm:$0xff] }
  0x1b   :  { %v48_v55 = vld [vmem:[%s1124_s1 + $0x18] sm:$0xff]  ;;  %v49_v56 = vld [vmem:[%s1124_s1 + $0x20] sm:$0xff]  ;;  %v50_v57 = vld [vmem:[%s1124_s1 + $0x28] sm:$0xff] }
  0x1c   :  { %v51_v58 = vld [vmem:[%s1124_s1 + $0x30] sm:$0xff]  ;;  %v52_v59 = vld [vmem:[%s1124_s1 + $0x38] sm:$0xff]  ;;  %v53_v60 = vld [vmem:[%s1126_s3] sm:$0xff] }
  0x1d   :  { %315 = vperm.xlu0 %786, %v297_v29   ;;  %320 = vperm.xlu1 %787, %v298_v30   ;;  %v59_v38 = vld [vmem:[%s1126_s3 + $0x30] sm:$0xff]  ;;  %v60_v39 = vld [vmem:[%s1126_s3 + $0x38] sm:$0xff] }
  0x1e   :  { %708 = vmatprep.mubr.msk.f32.mxu1 %vm343_vm2, %v53_v60 }
  0x1f   :  { %743 = vmatpush3.bf16.xpose.msk.msra.mxu0 %vm900_vm1, %v738_v21 }
  0x20   :  { %746 = vmatprep.subr.msk.bf16.mxu0 %vm900_vm1, %v744_v28 }
  0x21   :  { %325 = vperm.xlu0 %786, %v299_v33   ;;  %330 = vperm.xlu1 %787, %v300_v34   ;;  %v54_v33 = vld [vmem:[%s1126_s3 + $0x8] sm:$0xff]  ;;  %v55_v34 = vld [vmem:[%s1126_s3 + $0x10] sm:$0xff] }
  0x25   :  { %335 = vperm.xlu0 %786, %v301_v36   ;;  %340 = vperm.xlu1 %787, %v302_v37   ;;  %v57_v36 = vld [vmem:[%s1126_s3 + $0x20] sm:$0xff]  ;;  %v58_v37 = vld [vmem:[%s1126_s3 + $0x28] sm:$0xff] }
  0x27   :  { %749 = vmatpush3.bf16.xpose.msk.msra.mxu0 %vm900_vm1, %v744_v28 }
  0x28   :  { %752 = vmatprep.subr.msk.bf16.mxu0 %vm900_vm1, %v750_v35 }
  0x29   :  { %491 = vperm.xlu0 %786, %v481_v40   ;;  %496 = vperm.xlu1 %787, %v482_v41  }
  0x2d   :  { %501 = vperm.xlu0 %786, %v483_v43   ;;  %506 = vperm.xlu1 %787, %v484_v44  }
  0x2f   :  { %755 = vmatpush3.bf16.xpose.msk.msra.mxu0 %vm900_vm1, %v750_v35  ;;  %v56_v35 = vld [vmem:[%s1126_s3 + $0x18] sm:$0xff]  ;;  %s845_s3 = smov [#allocation3]  }
  0x30   :  { %758 = vmatprep.subr.msk.bf16.mxu0 %vm900_vm1, %v756_v42  ;;  %s568_s9 = sshll.u32 %s845_s3, 4  ;;  %s569_s9 = int_to_ptr.vmem [resolvable:$true] %s568_s9 }
  0x31   :  { %511 = vperm.xlu0 %786, %v485_v47   ;;  %516 = vperm.xlu1 %787, %v486_v48   ;;  %s820_s10 = scalar_lea.vmem %s569_s9, 16  ;;  %s824_s11 = scalar_lea.vmem %s569_s9, 32 }
  0x32   :  { %p821_p0 = scmp.ne.s32.totalorder %s569_s9, %s820_s10  ;;  %p825_p1 = scmp.lt.s32.totalorder %s569_s9, %s569_s9 }
  0x33   :  { %p826_p2 = scmp.lt.s32.totalorder %s824_s11, %s820_s10 }
  0x35   :  { %521 = vperm.xlu0 %786, %v487_v50   ;;  %526 = vperm.xlu1 %787, %v488_v51   ;;  %p827_p3 = por %p826_p2, %p825_p1 }
  0x37   :  { %761 = vmatpush3.bf16.xpose.msk.msra.mxu0 %vm900_vm1, %v756_v42  ;;  %p828_p4 = pnand %p827_p3, %p821_p0 }
  0x38   :  { %764 = vmatprep.subr.msk.bf16.mxu0 %vm900_vm1, %v762_v49 }
  0x39   :  { %553 = vperm.xlu0 %786, %v550_v52  }
  0x3f   :  { %767 = vmatpush3.bf16.xpose.msk.msra.mxu0 %vm900_vm1, %v762_v49 }
  0x46   :  { %681 = vmatmul.mubr.msk.f32.vlgmr.msra.gmra.mrb[0].mxu0 %vm109_vm0, %v46_v53 }
  0x47   :  { %683 = vmatprep.mubr.msk.f32.mxu0 %vm109_vm0, %v47_v54 }
  0x4a   :  { %684 = vmatmul.mubr.msk.f32.gmra.mrb[2].mxu0 %vm109_vm0, %v48_v55 }
  0x4b   :  { %686 = vmatprep.mubr.msk.f32.mxu0 %vm109_vm0, %v49_v56 }
  0x4e   :  { %687 = vmatmul.mubr.msk.f32.gmra.mrb[4].mxu0 %vm109_vm0, %v50_v57 }
  0x4f   :  { %689 = vmatprep.mubr.msk.f32.mxu0 %vm109_vm0, %v51_v58 }
  0x52   :  { %690 = vmatmul.mubr.msk.f32.gmra.mrb[6].mxu0 %vm109_vm0, %v52_v59 }
  0x85   :  { %v82_v62 = vpop.permute.xlu1 %81 }
  0x86   :  { %v72_v61 = vpop.permute.xlu0 %71 }
  0x89   :  { %v87_v0 = vpop.permute.xlu1 %86 }
  0x8a   :  { %v77_v63 = vpop.permute.xlu0 %76 }
  0x90   :  { %v97_v8 = vpop.permute.xlu1 %96  ;;  %v92_v10 = vpop.permute.xlu0 %91 }
  0x94   :  { %v107_v15 = vpop.permute.xlu1 %106  ;;  %v102_v18 = vpop.permute.xlu0 %101 }
  0x98   :  { %v306_v40 = vpop.permute.xlu0 %305  ;;  %v311_v41 = vpop.permute.xlu1 %310 }
  0x9c   :  { %v316_v42 = vpop.permute.xlu0 %315  ;;  %v321_v43 = vpop.permute.xlu1 %320 }
  0xa0   :  { %v326_v44 = vpop.permute.xlu0 %325  ;;  %v331_v45 = vpop.permute.xlu1 %330 }
  0xa4   :  { %v336_v49 = vpop.permute.xlu0 %335  ;;  %v341_v51 = vpop.permute.xlu1 %340 }
  0xa8   :  { %v492_v56 = vpop.permute.xlu0 %491  ;;  %v497_v60 = vpop.permute.xlu1 %496 }
 0x119   :  { %v682_v1 = vpop.f32.mrb[0].mxu0 }
 0x11a   :  { %v254_v2 = vadd.f32 %v682_v1, %v77_v63  ;;  %v248_v3 = vpop.f32.mrb[1].mxu0 }
 0x11b   :  { %v249_v4 = vadd.f32 %v248_v3, %v72_v61  ;;  %v502_v3 = vpop.permute.xlu0 %501 }
 0x11c   :  { %788 = vtanh.f32 %v254_v2 }
 0x11d   :  { %790 = vtanh.f32 %v249_v4  ;;  %v685_v5 = vpop.f32.mrb[2].mxu0 }
 0x11e   :  { %v264_v6 = vadd.f32 %v685_v5, %v87_v0  ;;  %v258_v7 = vpop.f32.mrb[3].mxu0 }
 0x11f   :  { %v259_v9 = vadd.f32 %v258_v7, %v82_v62  ;;  %v507_v7 = vpop.permute.xlu1 %506 }
 0x120   :  { %792 = vtanh.f32 %v264_v6 }
 0x121   :  { %794 = vtanh.f32 %v259_v9  ;;  %v688_v11 = vpop.f32.mrb[4].mxu0 }
 0x122   :  { %v274_v12 = vadd.f32 %v688_v11, %v97_v8  ;;  %v268_v13 = vpop.f32.mrb[5].mxu0 }
 0x123   :  { %v269_v14 = vadd.f32 %v268_v13, %v92_v10 }
 0x124   :  { %796 = vtanh.f32 %v274_v12  ;;  %v512_v12 = vpop.permute.xlu0 %511 }
 0x125   :  { %798 = vtanh.f32 %v269_v14  ;;  %v691_v16 = vpop.f32.mrb[6].mxu0 }
 0x126   :  { %v789_v17 = vpop.eup %788  ;;  %v284_v19 = vadd.f32 %v691_v16, %v107_v15  ;;  %v278_v20 = vpop.f32.mrb[7].mxu0 }
 0x127   :  { %v791_v21 = vpop.eup %790  ;;  %v279_v22 = vadd.f32 %v278_v20, %v102_v18 }
 0x128   :  { %800 = vtanh.f32 %v284_v19  ;;  %v768_v23 = vpack.c.bf16 %v789_v17, %v791_v21  ;;  %v517_v17 = vpop.permute.xlu1 %516 }
 0x129   :  { %802 = vtanh.f32 %v279_v22 }
 0x12a   :  { %v793_v24 = vpop.eup %792  ;;  %769 = vmatprep.subr.bf16.mxu1 %v768_v23 }
 0x12b   :  { %v795_v25 = vpop.eup %794  ;;  %771 = vmatpush3.bf16.msra.mxu1 %v768_v23 }
 0x12c   :  { %v772_v26 = vpack.c.bf16 %v793_v24, %v795_v25  ;;  %v522_v24 = vpop.permute.xlu0 %521 }
 0x12e   :  { %v797_v27 = vpop.eup %796  ;;  %773 = vmatprep.subr.bf16.mxu1 %v772_v26 }
 0x12f   :  { %v799_v28 = vpop.eup %798  ;;  %775 = vmatpush3.bf16.msra.mxu1 %v772_v26 }
 0x130   :  { %v776_v29 = vpack.c.bf16 %v797_v27, %v799_v28  ;;  %v527_v27 = vpop.permute.xlu1 %526 }
 0x132   :  { %v801_v30 = vpop.eup %800  ;;  %777 = vmatprep.subr.bf16.mxu1 %v776_v29 }
 0x133   :  { %v803_v31 = vpop.eup %802  ;;  %779 = vmatpush3.bf16.msra.mxu1 %v776_v29 }
 0x134   :  { %v780_v32 = vpack.c.bf16 %v801_v30, %v803_v31  ;;  %v556_v30 = vlaneseq }
 0x136   :  { %781 = vmatprep.subr.bf16.mxu1 %v780_v32 }
 0x137   :  { %783 = vmatpush3.bf16.msra.mxu1 %v780_v32 }
 0x13a   :  { %709 = vmatmul.mubr.msk.f32.vlgmr.msra.gmra.mrb[0].mxu1 %vm343_vm2, %v54_v33  ;;  %v557_v33 = vshrl.u32 %v556_v30, 7 }
 0x13b   :  { %711 = vmatprep.mubr.msk.f32.mxu1 %vm343_vm2, %v55_v34 }
 0x13e   :  { %712 = vmatmul.mubr.msk.f32.gmra.mrb[2].mxu1 %vm343_vm2, %v56_v35 }
 0x13f   :  { %714 = vmatprep.mubr.msk.f32.mxu1 %vm343_vm2, %v57_v36  ;;  %v558_v36 = vsub.s32 0, %v557_v33 }
 0x142   :  { %715 = vmatmul.mubr.msk.f32.gmra.mrb[4].mxu1 %vm343_vm2, %v58_v37 }
 0x143   :  { %717 = vmatprep.mubr.msk.f32.mxu1 %vm343_vm2, %v59_v38  ;;  %v554_v38 = vpop.permute.xlu0 %553 }
 0x146   :  { %718 = vmatmul.mubr.msk.f32.gmra.mrb[6].mxu1 %vm343_vm2, %v60_v39 }
 0x20d   :  { %v710_v46 = vpop.f32.mrb[0].mxu1 }
 0x20e   :  { %v440_v47 = vadd.f32 %v710_v46, %v311_v41  ;;  %v434_v48 = vpop.f32.mrb[1].mxu1 }
 0x20f   :  { %v435_v50 = vadd.f32 %v434_v48, %v306_v40  ;;  %v559_v40 = vrot.slane %v554_v38, %v558_v36 }
 0x210   :  { %804 = vtanh.f32 %v440_v47 }
 0x211   :  { %806 = vtanh.f32 %v435_v50  ;;  %v713_v52 = vpop.f32.mrb[2].mxu1 }
 0x212   :  { %v450_v53 = vadd.f32 %v713_v52, %v321_v43  ;;  %v444_v54 = vpop.f32.mrb[3].mxu1 }
 0x213   :  { %v445_v55 = vadd.f32 %v444_v54, %v316_v42 }
 0x214   :  { %808 = vtanh.f32 %v450_v53 }
 0x215   :  { %810 = vtanh.f32 %v445_v55  ;;  %v716_v57 = vpop.f32.mrb[4].mxu1 }
 0x216   :  { %v460_v58 = vadd.f32 %v716_v57, %v331_v45  ;;  %v454_v59 = vpop.f32.mrb[5].mxu1 }
 0x217   :  { %v455_v61 = vadd.f32 %v454_v59, %v326_v44 }
 0x218   :  { %812 = vtanh.f32 %v460_v58 }
 0x219   :  { %814 = vtanh.f32 %v455_v61  ;;  %v719_v62 = vpop.f32.mrb[6].mxu1 }
 0x21a   :  { %v805_v63 = vpop.eup %804  ;;  %v470_v0 = vadd.f32 %v719_v62, %v341_v51  ;;  %v464_v1 = vpop.f32.mrb[7].mxu1 }
 0x21b   :  { %v807_v2 = vpop.eup %806  ;;  %v530_v4 = vmul.f32 %v805_v63, %v497_v60  ;;  %v465_v5 = vadd.f32 %v464_v1, %v336_v49 }
 0x21c   :  { %v529_v6 = vmul.f32 %v807_v2, %v492_v56  ;;  %816 = vtanh.f32 %v470_v0 }
 0x21d   :  { %818 = vtanh.f32 %v465_v5 }
 0x21e   :  { %v809_v8 = vpop.eup %808  ;;  %v537_v9 = vadd.f32 %v530_v4, %v529_v6 }
 0x21f   :  { %v811_v10 = vpop.eup %810  ;;  %v532_v14 = vmul.f32 %v809_v8, %v507_v7 }
 0x220   :  { %v531_v11 = vmul.f32 %v811_v10, %v502_v3 }
 0x222   :  { %v813_v13 = vpop.eup %812  ;;  %v538_v15 = vadd.f32 %v537_v9, %v531_v11 }
 0x223   :  { %v815_v16 = vpop.eup %814  ;;  %v534_v21 = vmul.f32 %v813_v13, %v517_v17 }
 0x224   :  { %v533_v18 = vmul.f32 %v815_v16, %v512_v12  ;;  %v539_v19 = vadd.f32 %v538_v15, %v532_v14 }
 0x226   :  { %v817_v20 = vpop.eup %816  ;;  %v540_v22 = vadd.f32 %v539_v19, %v533_v18 }
 0x227   :  { %v819_v23 = vpop.eup %818  ;;  %v536_v28 = vmul.f32 %v817_v20, %v527_v27 }
 0x228   :  { %v535_v25 = vmul.f32 %v819_v23, %v522_v24  ;;  %v541_v26 = vadd.f32 %v540_v22, %v534_v21 }
 0x22a   :  { %v542_v29 = vadd.f32 %v541_v26, %v535_v25 }
 0x22c   :  { %v543_v31 = vadd.f32 %v542_v29, %v536_v28 }
 0x22e   :  { %v544_v32 = vrot.slane %v543_v31, 4 }
 0x230   :  { %v545_v34 = vadd.f32 %v544_v32, %v543_v31 }
 0x232   :  { %v546_v35 = vrot.slane %v545_v34, 2 }
 0x234   :  { %v547_v37 = vadd.f32 %v546_v35, %v545_v34 }
 0x236   :  { %v548_v39 = vrot.slane %v547_v37, 1 }
 0x238   :  { %v549_v41 = vadd.f32 %v548_v39, %v547_v37 }
 0x23a   :  { %v560_v42 = vadd.f32 %v559_v40, %v549_v41 }
 0x23c   :  { %561 = vst [vmem:[#allocation3] sm:$0x1] %v560_v42 }
 0x23d   :  { %831 = shalt.err (!%p828_p4)
}
 0x23e   :  { %s832_s13 = scalar_lea.hbm %s1130_s7, 16 }
 0x23f   :  { %p833_p5 = scmp.ne.s32.totalorder %s1130_s7, %s832_s13  ;;  %p836_p6 = scmp.lt.u32.totalorder %s832_s13, %s1130_s7 }
 0x241   :  { %p838_p7 = pnand %p836_p6, %p833_p5 }
 0x243   :  { %841 = shalt.err (!%p838_p7)
}
 0x244   :  { %571 = dma.vmem_to_hbm [thread:$0]  %s569_s9, 16, %s1130_s7, [#allocation4]  }
 0x245   :  { %842 = dma.done.wait [#allocation4], 16  }
 0x246   :  { %843 = vsyncadd [#allocation4], 4294967280 }
 0x247   :  { %575 = vsyncpa [#allocation4], 1 }

</bundles_post_ra>
